<compile_context>
chip_gen: v7x
topology: tpu7x:2x2x1
jax: 0.10.0
libtpu: 0.0.40
codegen_flags: <defaults>
</compile_context>

<pallas_src>
import numpy as np
import jax
import jax.numpy as jnp
from jax import lax
from jax.experimental import pallas as pl
from jax.experimental.pallas import tpu as pltpu


def _sigmoid(x):
    # tanh-form sigmoid: one EUP tanh instead of exp + reciprocal.
    return 0.5 * (jnp.tanh(0.5 * x) + 1.0)


# ----------------------------- Pallas kernel --------------------------------
def make_gru_kernel(unroll):
    def gru_kernel(x_ref, lens_ref, w_i3_ref, w_h3_ref, b_i3_ref, b_hn_ref,
                   out_ref, g3_ref, h_ref):
        """One (batch-block, time-chunk) grid step of the GRU recurrence.

        x_ref   : (Tc, TB, D)  bf16  time-major input chunk
        lens_ref: (TB, 1)      int32 sequence lengths (0 for padded rows)
        w_i3_ref: (D, 3H)      bf16  fused input weights, gate order r|z|n
        w_h3_ref: (H, 3H)      bf16  fused hidden weights, gate order r|z|n
        b_i3_ref: (1, 3H)      f32   [b_ir+b_hr | b_iz+b_hz | b_in]
        b_hn_ref: (1, H)       f32   hidden bias of n gate (stays inside r*(.))
        out_ref : (TB, H)      f32   final hidden state for this batch block
        g3_ref  : (Tc, TB, 3H) f32   scratch: input-path gate pre-activations
        h_ref   : (TB, H)      f32   scratch: hidden state carried across chunks
        """
        t_chunk = pl.program_id(1)
        Tc, TB, D = x_ref.shape
        H = out_ref.shape[-1]

        @pl.when(t_chunk == 0)
        def _():
            h_ref[...] = jnp.zeros_like(h_ref)          # init_lstm = 0

        # Fused one-shot input projection for the whole chunk (off the serial
        # critical path): bf16 operands on the MXU, f32 accumulation.
        x2d = x_ref[...].reshape(Tc * TB, D)             # sublane-aligned merge
        g3 = jnp.dot(x2d, w_i3_ref[...], preferred_element_type=jnp.float32)
        g3_ref[...] = (g3 + b_i3_ref[...]).reshape(Tc, TB, 3 * H)
        # TODO(synk): store g3 in bf16 on v7x at production sizes (upcast on read).

        # Hoisted loop invariants.
        w_h3 = w_h3_ref[...]                             # (H, 3H) bf16
        b_hn = b_hn_ref[...]                             # (1, H)  f32
        lens = lens_ref[...]                             # (TB, 1) int32
        t0 = t_chunk * Tc

        def step(tt, h_prev):
            g = g3_ref[tt]                               # (TB, 3H) f32
            # Single fused hidden matmul per step (3x fewer weight pushes on
            # the serial critical path than per-gate matmuls).
            gh = jnp.dot(h_prev.astype(jnp.bfloat16), w_h3,
                         preferred_element_type=jnp.float32)    # (TB, 3H)
            r = _sigmoid(g[:, :H] + gh[:, :H])
            z = _sigmoid(g[:, H:2 * H] + gh[:, H:2 * H])
            n = jnp.tanh(g[:, 2 * H:] + r * (gh[:, 2 * H:] + b_hn))
            h_new = n + z * (h_prev - n)                 # == (1-z)*n + z*h_prev
            # Freeze once the sequence has ended (pack/pad semantics); padded
            # time steps (t >= original T) and zero-length rows stay frozen.
            return jnp.where(t0 + tt < lens, h_new, h_prev)

        h = lax.fori_loop(0, Tc, step, h_ref[...], unroll=unroll)
        h_ref[...] = h

        @pl.when(t_chunk == pl.num_programs(1) - 1)
        def _():
            out_ref[...] = h

    return gru_kernel


# ------------------------------- wrapper -------------------------------------
def gru_encoder_forward(sent, sent_len, w_ih, w_hh, b_ih, b_hh, *,
                        batch_tile=8, time_chunk=8, unroll=4):
    """sent: (T, B, D) f32, sent_len: (B,) int. Returns emb (B, H) float32.

    w_ih: (3H, D), w_hh: (3H, H), b_ih/b_hh: (3H,) in PyTorch nn.GRU layout
    (gate order r, z, n).
    """
    sent = jnp.asarray(sent, jnp.float32)
    w_ih = jnp.asarray(w_ih, jnp.float32)
    w_hh = jnp.asarray(w_hh, jnp.float32)
    b_ih = jnp.asarray(b_ih, jnp.float32)
    b_hh = jnp.asarray(b_hh, jnp.float32)

    T, B, D = sent.shape
    H = w_hh.shape[1]                        # PyTorch w_hh is (3H, H)

    TB = max(8, int(batch_tile))             # sublane-aligned batch tile
    Bp = pl.cdiv(B, TB) * TB
    nb = Bp // TB
    Tc = max(1, min(int(time_chunk), T))
    nt = pl.cdiv(T, Tc)
    Tp = nt * Tc

    # Pad batch to the tile and time to the chunk. Padded rows have len 0 and
    # padded steps satisfy t >= len, so the freeze keeps them inert.
    sent_p = jnp.pad(sent, ((0, Tp - T), (0, Bp - B), (0, 0))).astype(jnp.bfloat16)
    lens_p = jnp.pad(jnp.asarray(sent_len, jnp.int32), (0, Bp - B)).reshape(Bp, 1)

    # Fused gate-weight layout (r|z|n along the 3H lane axis); bf16 MXU
    # operands, f32 accumulate + f32 gate math in the kernel.
    # TODO(synk): do these transposes/concats once at parameter-load time in a
    # real model instead of per forward call.
    w_i3 = w_ih.T.astype(jnp.bfloat16)       # (D, 3H)
    w_h3 = w_hh.T.astype(jnp.bfloat16)       # (H, 3H)
    # r/z gates: input + hidden biases add -> combine; n gate: keep b_hn inside.
    b_i3 = jnp.concatenate([b_ih[:2 * H] + b_hh[:2 * H],
                            b_ih[2 * H:]]).reshape(1, 3 * H)
    b_hn = b_hh[2 * H:].reshape(1, H)

    # Scoped-VMEM budget: double-buffered blocked I/O + resident weights +
    # scratches, with headroom.
    vmem_need = (
        2 * Tc * TB * D * 2            # x chunk (bf16), double-buffered
        + 2 * TB * 4                   # lens
        + (D + H) * 3 * H * 2          # w_i3 + w_h3 (bf16)
        + 4 * H * 4                    # biases (f32)
        + 2 * TB * H * 4               # out block, double-buffered
        + Tc * TB * 3 * H * 4          # g3 scratch
        + TB * H * 4                   # h carry scratch
    )
    vmem_limit = int(min(max(2 * vmem_need, 4 << 20) + (1 << 20), 64 << 20))

    kernel = make_gru_kernel(unroll=max(1, min(int(unroll), Tc)))

    out = pl.pallas_call(
        kernel,
        out_shape=jax.ShapeDtypeStruct((Bp, H), jnp.float32),
        grid=(nb, nt),
        in_specs=[
            pl.BlockSpec((Tc, TB, D), lambda b, t: (t, b, 0)),    # x chunk
            pl.BlockSpec((TB, 1), lambda b, t: (b, 0)),           # lens
            pl.BlockSpec((D, 3 * H), lambda b, t: (0, 0)),        # w_i3
            pl.BlockSpec((H, 3 * H), lambda b, t: (0, 0)),        # w_h3
            pl.BlockSpec((1, 3 * H), lambda b, t: (0, 0)),        # b_i3
            pl.BlockSpec((1, H), lambda b, t: (0, 0)),            # b_hn
        ],
        out_specs=pl.BlockSpec((TB, H), lambda b, t: (b, 0)),
        scratch_shapes=[
            pltpu.VMEM((Tc, TB, 3 * H), jnp.float32),   # gate pre-activations
            pltpu.VMEM((TB, H), jnp.float32),           # carried hidden state
        ],
        compiler_params=pltpu.CompilerParams(
            dimension_semantics=("parallel", "arbitrary"),
            vmem_limit_bytes=vmem_limit,
        ),
    )(sent_p, lens_p, w_i3, w_h3, b_i3, b_hn)

    return out[:B]


# --------------------------- pure-JAX reference ------------------------------
def gru_encoder_ref(sent, sent_len, w_ih, w_hh, b_ih, b_hh):
    T, B, D = sent.shape
    H = w_hh.shape[1]
    w_ih_t = w_ih.T
    w_hh_t = w_hh.T
    lens = sent_len.reshape(B, 1)

    def step(h, inp):
        x_t, t = inp
        gi = x_t @ w_ih_t + b_ih
        gh = h @ w_hh_t + b_hh
        r = jax.nn.sigmoid(gi[:, :H] + gh[:, :H])
        z = jax.nn.sigmoid(gi[:, H:2 * H] + gh[:, H:2 * H])
        n = jnp.tanh(gi[:, 2 * H:] + r * gh[:, 2 * H:])
        h_new = (1.0 - z) * n + z * h
        h_out = jnp.where(t < lens, h_new, h)
        return h_out, None

    h0 = jnp.zeros((B, H), jnp.float32)
    h_final, _ = lax.scan(step, h0, (sent, jnp.arange(T, dtype=jnp.int32)))
    return h_final


# --------------------------------- main --------------------------------------
if __name__ == "__main__":
    # config: bsize=4, word_emb_dim=16, enc_lstm_dim=32 (pool_type unused;
    # dropout on a 1-layer GRU is a no-op). Toy shapes: correctness only.
    T, B, D, H = 8, 4, 16, 32

    key = jax.random.PRNGKey(0)
    k_sent, k_wih, k_whh, k_bih, k_bhh = jax.random.split(key, 5)

    sent = jax.random.normal(k_sent, (T, B, D), dtype=jnp.float32)
    sent_len = jnp.array([8, 3, 5, 1], dtype=jnp.int32)

    # Synthetic GRU parameters in PyTorch layout: (3H, D), (3H, H), (3H,), (3H,)
    scale = 1.0 / np.sqrt(H)
    w_ih = jax.random.uniform(k_wih, (3 * H, D), jnp.float32, -scale, scale)
    w_hh = jax.random.uniform(k_whh, (3 * H, H), jnp.float32, -scale, scale)
    b_ih = jax.random.uniform(k_bih, (3 * H,), jnp.float32, -scale, scale)
    b_hh = jax.random.uniform(k_bhh, (3 * H,), jnp.float32, -scale, scale)

    emb = gru_encoder_forward(sent, sent_len, w_ih, w_hh, b_ih, b_hh,
                              batch_tile=8, time_chunk=4, unroll=4)
    emb = jax.block_until_ready(emb)

    ref = jax.block_until_ready(
        gru_encoder_ref(sent, sent_len, w_ih, w_hh, b_ih, b_hh))

    assert emb.shape == (B, H) and emb.dtype == jnp.float32
    # bf16 MXU operands (f32 accumulation / gate math) vs the all-f32 reference.
    np.testing.assert_allclose(np.asarray(emb), np.asarray(ref),
                               rtol=2e-2, atol=2e-2)

    print("KERNEL_OK")
</pallas_src>

<mosaic_0001>
module attributes {stable_mosaic.version = 11 : i64} {
  func.func @gru_kernel(%arg0: i32, %arg1: i32, %arg2: memref<4x8x16xbf16, #tpu.memory_space<vmem>>, %arg3: memref<8x1xi32, #tpu.memory_space<vmem>>, %arg4: memref<16x96xbf16, #tpu.memory_space<vmem>>, %arg5: memref<32x96xbf16, #tpu.memory_space<vmem>>, %arg6: memref<1x96xf32, #tpu.memory_space<vmem>>, %arg7: memref<1x32xf32, #tpu.memory_space<vmem>>, %arg8: memref<8x32xf32, #tpu.memory_space<vmem>>, %arg9: memref<4x8x96xf32, #tpu.memory_space<vmem>>, %arg10: memref<8x32xf32, #tpu.memory_space<vmem>>) attributes {dimension_semantics = [#tpu.dimension_semantics<parallel>, #tpu.dimension_semantics<arbitrary>], iteration_bounds = array<i64: 1, 2>, scalar_prefetch = 0 : i64, scratch_operands = 2 : i64, tpu.core_type = #tpu.core_type<tc>, window_params = [{transform_indices = @transform_0, window_bounds = array<i64: 4, 8, 16>}, {transform_indices = @transform_1, window_bounds = array<i64: 8, 1>}, {pipeline_mode = #tpu.pipeline_mode<synchronous>, transform_indices = @transform_2, window_bounds = array<i64: 16, 96>}, {pipeline_mode = #tpu.pipeline_mode<synchronous>, transform_indices = @transform_3, window_bounds = array<i64: 32, 96>}, {pipeline_mode = #tpu.pipeline_mode<synchronous>, transform_indices = @transform_4, window_bounds = array<i64: 1, 96>}, {pipeline_mode = #tpu.pipeline_mode<synchronous>, transform_indices = @transform_5, window_bounds = array<i64: 1, 32>}, {transform_indices = @transform_6, window_bounds = array<i64: 8, 32>}]} {
    %c0_i32 = arith.constant 0 : i32
    %0 = arith.cmpi eq, %arg1, %c0_i32 : i32
    %1 = arith.extui %0 : i1 to i32
    %c0_i32_0 = arith.constant 0 : i32
    %2 = arith.cmpi ne, %1, %c0_i32_0 : i32
    scf.if %2 {
      %cst_60 = arith.constant 0.000000e+00 : f32
      %185 = vector.broadcast %cst_60 : f32 to vector<8x32xf32>
      %c0_61 = arith.constant 0 : index
      %c0_62 = arith.constant 0 : index
      %186 = vector.load %arg10[%c0_61, %c0_62] : memref<8x32xf32, #tpu.memory_space<vmem>>, vector<8x32xf32>
      tpu.vector_store %arg10[%c0_61, %c0_62], %185 {strides = array<i32>} : memref<8x32xf32, #tpu.memory_space<vmem>>, vector<8x32xf32>,
    } else {
    }
    %c0 = arith.constant 0 : index
    %c0_1 = arith.constant 0 : index
    %c0_2 = arith.constant 0 : index
    %3 = vector.load %arg2[%c0, %c0_1, %c0_2] : memref<4x8x16xbf16, #tpu.memory_space<vmem>>, vector<4x8x16xbf16>
    %4 = vector.shape_cast %3 : vector<4x8x16xbf16> to vector<32x16xbf16>
    %c0_3 = arith.constant 0 : index
    %c0_4 = arith.constant 0 : index
    %5 = vector.load %arg4[%c0_3, %c0_4] : memref<16x96xbf16, #tpu.memory_space<vmem>>, vector<16x96xbf16>
    %cst = arith.constant dense<0.000000e+00> : vector<32x96xf32>
    %6 = tpu.matmul %4, %5, %cst {dimension_numbers = #tpu.dot_dimension_numbers<[1], [0], [0], [1], [0, 0, 1, 1], [], []>} : vector<32x16xbf16>, vector<16x96xbf16>, vector<32x96xf32> -> vector<32x96xf32>
    %c0_5 = arith.constant 0 : index
    %c0_6 = arith.constant 0 : index
    %7 = vector.load %arg6[%c0_5, %c0_6] : memref<1x96xf32, #tpu.memory_space<vmem>>, vector<1x96xf32>
    %8 = vector.broadcast %7 : vector<1x96xf32> to vector<32x96xf32>
    %9 = arith.addf %6, %8 : vector<32x96xf32>
    %10 = vector.shape_cast %9 : vector<32x96xf32> to vector<4x8x96xf32>
    %c0_7 = arith.constant 0 : index
    %c0_8 = arith.constant 0 : index
    %c0_9 = arith.constant 0 : index
    %11 = vector.load %arg9[%c0_7, %c0_8, %c0_9] : memref<4x8x96xf32, #tpu.memory_space<vmem>>, vector<4x8x96xf32>
    tpu.vector_store %arg9[%c0_7, %c0_8, %c0_9], %10 {strides = array<i32>} : memref<4x8x96xf32, #tpu.memory_space<vmem>>, vector<4x8x96xf32>,
    %c0_10 = arith.constant 0 : index
    %c0_11 = arith.constant 0 : index
    %12 = vector.load %arg5[%c0_10, %c0_11] : memref<32x96xbf16, #tpu.memory_space<vmem>>, vector<32x96xbf16>
    %c0_12 = arith.constant 0 : index
    %c0_13 = arith.constant 0 : index
    %13 = vector.load %arg7[%c0_12, %c0_13] : memref<1x32xf32, #tpu.memory_space<vmem>>, vector<1x32xf32>
    %c0_14 = arith.constant 0 : index
    %c0_15 = arith.constant 0 : index
    %14 = vector.load %arg3[%c0_14, %c0_15] : memref<8x1xi32, #tpu.memory_space<vmem>>, vector<8x1xi32>
    %c4_i32 = arith.constant 4 : i32
    %15 = arith.muli %arg1, %c4_i32 : i32
    %c0_16 = arith.constant 0 : index
    %c0_17 = arith.constant 0 : index
    %16 = vector.load %arg10[%c0_16, %c0_17] : memref<8x32xf32, #tpu.memory_space<vmem>>, vector<8x32xf32>
    %c0_i32_18 = arith.constant 0 : i32
    %17 = arith.index_cast %c0_i32_18 : i32 to index
    %c0_19 = arith.constant 0 : index
    %c0_20 = arith.constant 0 : index
    %18 = vector.load %arg9[%17, %c0_19, %c0_20] : memref<4x8x96xf32, #tpu.memory_space<vmem>>, vector<1x8x96xf32>
    %19 = vector.shape_cast %18 : vector<1x8x96xf32> to vector<8x96xf32>
    %20 = arith.truncf %16 : vector<8x32xf32> to vector<8x32xbf16>
    %cst_21 = arith.constant dense<0.000000e+00> : vector<8x96xf32>
    %21 = tpu.matmul %20, %12, %cst_21 {dimension_numbers = #tpu.dot_dimension_numbers<[1], [0], [0], [1], [0, 0, 1, 1], [], []>} : vector<8x32xbf16>, vector<32x96xbf16>, vector<8x96xf32> -> vector<8x96xf32>
    %22 = vector.extract_strided_slice %19 {offsets = [0, 0], sizes = [8, 32], strides = [1, 1]} : vector<8x96xf32> to vector<8x32xf32>
    %23 = vector.extract_strided_slice %21 {offsets = [0, 0], sizes = [8, 32], strides = [1, 1]} : vector<8x96xf32> to vector<8x32xf32>
    %24 = arith.addf %22, %23 : vector<8x32xf32>
    %cst_22 = arith.constant 5.000000e-01 : f32
    %25 = vector.broadcast %cst_22 : f32 to vector<8x32xf32>
    %26 = arith.mulf %25, %24 : vector<8x32xf32>
    %27 = math.tanh %26 : vector<8x32xf32>
    %cst_23 = arith.constant 1.000000e+00 : f32
    %28 = vector.broadcast %cst_23 : f32 to vector<8x32xf32>
    %29 = arith.addf %27, %28 : vector<8x32xf32>
    %cst_24 = arith.constant 5.000000e-01 : f32
    %30 = vector.broadcast %cst_24 : f32 to vector<8x32xf32>
    %31 = arith.mulf %30, %29 : vector<8x32xf32>
    %32 = vector.extract_strided_slice %19 {offsets = [0, 32], sizes = [8, 32], strides = [1, 1]} : vector<8x96xf32> to vector<8x32xf32>
    %33 = vector.extract_strided_slice %21 {offsets = [0, 32], sizes = [8, 32], strides = [1, 1]} : vector<8x96xf32> to vector<8x32xf32>
    %34 = arith.addf %32, %33 : vector<8x32xf32>
    %cst_25 = arith.constant 5.000000e-01 : f32
    %35 = vector.broadcast %cst_25 : f32 to vector<8x32xf32>
    %36 = arith.mulf %35, %34 : vector<8x32xf32>
    %37 = math.tanh %36 : vector<8x32xf32>
    %cst_26 = arith.constant 1.000000e+00 : f32
    %38 = vector.broadcast %cst_26 : f32 to vector<8x32xf32>
    %39 = arith.addf %37, %38 : vector<8x32xf32>
    %cst_27 = arith.constant 5.000000e-01 : f32
    %40 = vector.broadcast %cst_27 : f32 to vector<8x32xf32>
    %41 = arith.mulf %40, %39 : vector<8x32xf32>
    %42 = vector.extract_strided_slice %19 {offsets = [0, 64], sizes = [8, 32], strides = [1, 1]} : vector<8x96xf32> to vector<8x32xf32>
    %43 = vector.extract_strided_slice %21 {offsets = [0, 64], sizes = [8, 32], strides = [1, 1]} : vector<8x96xf32> to vector<8x32xf32>
    %44 = vector.broadcast %13 : vector<1x32xf32> to vector<8x32xf32>
    %45 = arith.addf %43, %44 : vector<8x32xf32>
    %46 = arith.mulf %31, %45 : vector<8x32xf32>
    %47 = arith.addf %42, %46 : vector<8x32xf32>
    %48 = math.tanh %47 : vector<8x32xf32>
    %49 = arith.subf %16, %48 : vector<8x32xf32>
    %50 = arith.mulf %41, %49 : vector<8x32xf32>
    %51 = arith.addf %48, %50 : vector<8x32xf32>
    %52 = arith.addi %15, %c0_i32_18 : i32
    %53 = vector.broadcast %52 : i32 to vector<8x1xi32>
    %54 = arith.cmpi slt, %53, %14 : vector<8x1xi32>
    %55 = vector.shape_cast %54 : vector<8x1xi1> to vector<8x1xi1>
    %56 = vector.broadcast %55 : vector<8x1xi1> to vector<8x32xi1>
    %57 = arith.select %56, %51, %16 : vector<8x32xi1>, vector<8x32xf32>
    %c1_i32 = arith.constant 1 : i32
    %58 = arith.index_cast %c1_i32 : i32 to index
    %c0_28 = arith.constant 0 : index
    %c0_29 = arith.constant 0 : index
    %59 = vector.load %arg9[%58, %c0_28, %c0_29] : memref<4x8x96xf32, #tpu.memory_space<vmem>>, vector<1x8x96xf32>
    %60 = vector.shape_cast %59 : vector<1x8x96xf32> to vector<8x96xf32>
    %61 = arith.truncf %57 : vector<8x32xf32> to vector<8x32xbf16>
    %cst_30 = arith.constant dense<0.000000e+00> : vector<8x96xf32>
    %62 = tpu.matmul %61, %12, %cst_30 {dimension_numbers = #tpu.dot_dimension_numbers<[1], [0], [0], [1], [0, 0, 1, 1], [], []>} : vector<8x32xbf16>, vector<32x96xbf16>, vector<8x96xf32> -> vector<8x96xf32>
    %63 = vector.extract_strided_slice %60 {offsets = [0, 0], sizes = [8, 32], strides = [1, 1]} : vector<8x96xf32> to vector<8x32xf32>
    %64 = vector.extract_strided_slice %62 {offsets = [0, 0], sizes = [8, 32], strides = [1, 1]} : vector<8x96xf32> to vector<8x32xf32>
    %65 = arith.addf %63, %64 : vector<8x32xf32>
    %cst_31 = arith.constant 5.000000e-01 : f32
    %66 = vector.broadcast %cst_31 : f32 to vector<8x32xf32>
    %67 = arith.mulf %66, %65 : vector<8x32xf32>
    %68 = math.tanh %67 : vector<8x32xf32>
    %cst_32 = arith.constant 1.000000e+00 : f32
    %69 = vector.broadcast %cst_32 : f32 to vector<8x32xf32>
    %70 = arith.addf %68, %69 : vector<8x32xf32>
    %cst_33 = arith.constant 5.000000e-01 : f32
    %71 = vector.broadcast %cst_33 : f32 to vector<8x32xf32>
    %72 = arith.mulf %71, %70 : vector<8x32xf32>
    %73 = vector.extract_strided_slice %60 {offsets = [0, 32], sizes = [8, 32], strides = [1, 1]} : vector<8x96xf32> to vector<8x32xf32>
    %74 = vector.extract_strided_slice %62 {offsets = [0, 32], sizes = [8, 32], strides = [1, 1]} : vector<8x96xf32> to vector<8x32xf32>
    %75 = arith.addf %73, %74 : vector<8x32xf32>
    %cst_34 = arith.constant 5.000000e-01 : f32
    %76 = vector.broadcast %cst_34 : f32 to vector<8x32xf32>
    %77 = arith.mulf %76, %75 : vector<8x32xf32>
    %78 = math.tanh %77 : vector<8x32xf32>
    %cst_35 = arith.constant 1.000000e+00 : f32
    %79 = vector.broadcast %cst_35 : f32 to vector<8x32xf32>
    %80 = arith.addf %78, %79 : vector<8x32xf32>
    %cst_36 = arith.constant 5.000000e-01 : f32
    %81 = vector.broadcast %cst_36 : f32 to vector<8x32xf32>
    %82 = arith.mulf %81, %80 : vector<8x32xf32>
    %83 = vector.extract_strided_slice %60 {offsets = [0, 64], sizes = [8, 32], strides = [1, 1]} : vector<8x96xf32> to vector<8x32xf32>
    %84 = vector.extract_strided_slice %62 {offsets = [0, 64], sizes = [8, 32], strides = [1, 1]} : vector<8x96xf32> to vector<8x32xf32>
    %85 = vector.broadcast %13 : vector<1x32xf32> to vector<8x32xf32>
    %86 = arith.addf %84, %85 : vector<8x32xf32>
    %87 = arith.mulf %72, %86 : vector<8x32xf32>
    %88 = arith.addf %83, %87 : vector<8x32xf32>
    %89 = math.tanh %88 : vector<8x32xf32>
    %90 = arith.subf %57, %89 : vector<8x32xf32>
    %91 = arith.mulf %82, %90 : vector<8x32xf32>
    %92 = arith.addf %89, %91 : vector<8x32xf32>
    %93 = arith.addi %15, %c1_i32 : i32
    %94 = vector.broadcast %93 : i32 to vector<8x1xi32>
    %95 = arith.cmpi slt, %94, %14 : vector<8x1xi32>
    %96 = vector.shape_cast %95 : vector<8x1xi1> to vector<8x1xi1>
    %97 = vector.broadcast %96 : vector<8x1xi1> to vector<8x32xi1>
    %98 = arith.select %97, %92, %57 : vector<8x32xi1>, vector<8x32xf32>
    %c2_i32 = arith.constant 2 : i32
    %99 = arith.index_cast %c2_i32 : i32 to index
    %c0_37 = arith.constant 0 : index
    %c0_38 = arith.constant 0 : index
    %100 = vector.load %arg9[%99, %c0_37, %c0_38] : memref<4x8x96xf32, #tpu.memory_space<vmem>>, vector<1x8x96xf32>
    %101 = vector.shape_cast %100 : vector<1x8x96xf32> to vector<8x96xf32>
    %102 = arith.truncf %98 : vector<8x32xf32> to vector<8x32xbf16>
    %cst_39 = arith.constant dense<0.000000e+00> : vector<8x96xf32>
    %103 = tpu.matmul %102, %12, %cst_39 {dimension_numbers = #tpu.dot_dimension_numbers<[1], [0], [0], [1], [0, 0, 1, 1], [], []>} : vector<8x32xbf16>, vector<32x96xbf16>, vector<8x96xf32> -> vector<8x96xf32>
    %104 = vector.extract_strided_slice %101 {offsets = [0, 0], sizes = [8, 32], strides = [1, 1]} : vector<8x96xf32> to vector<8x32xf32>
    %105 = vector.extract_strided_slice %103 {offsets = [0, 0], sizes = [8, 32], strides = [1, 1]} : vector<8x96xf32> to vector<8x32xf32>
    %106 = arith.addf %104, %105 : vector<8x32xf32>
    %cst_40 = arith.constant 5.000000e-01 : f32
    %107 = vector.broadcast %cst_40 : f32 to vector<8x32xf32>
    %108 = arith.mulf %107, %106 : vector<8x32xf32>
    %109 = math.tanh %108 : vector<8x32xf32>
    %cst_41 = arith.constant 1.000000e+00 : f32
    %110 = vector.broadcast %cst_41 : f32 to vector<8x32xf32>
    %111 = arith.addf %109, %110 : vector<8x32xf32>
    %cst_42 = arith.constant 5.000000e-01 : f32
    %112 = vector.broadcast %cst_42 : f32 to vector<8x32xf32>
    %113 = arith.mulf %112, %111 : vector<8x32xf32>
    %114 = vector.extract_strided_slice %101 {offsets = [0, 32], sizes = [8, 32], strides = [1, 1]} : vector<8x96xf32> to vector<8x32xf32>
    %115 = vector.extract_strided_slice %103 {offsets = [0, 32], sizes = [8, 32], strides = [1, 1]} : vector<8x96xf32> to vector<8x32xf32>
    %116 = arith.addf %114, %115 : vector<8x32xf32>
    %cst_43 = arith.constant 5.000000e-01 : f32
    %117 = vector.broadcast %cst_43 : f32 to vector<8x32xf32>
    %118 = arith.mulf %117, %116 : vector<8x32xf32>
    %119 = math.tanh %118 : vector<8x32xf32>
    %cst_44 = arith.constant 1.000000e+00 : f32
    %120 = vector.broadcast %cst_44 : f32 to vector<8x32xf32>
    %121 = arith.addf %119, %120 : vector<8x32xf32>
    %cst_45 = arith.constant 5.000000e-01 : f32
    %122 = vector.broadcast %cst_45 : f32 to vector<8x32xf32>
    %123 = arith.mulf %122, %121 : vector<8x32xf32>
    %124 = vector.extract_strided_slice %101 {offsets = [0, 64], sizes = [8, 32], strides = [1, 1]} : vector<8x96xf32> to vector<8x32xf32>
    %125 = vector.extract_strided_slice %103 {offsets = [0, 64], sizes = [8, 32], strides = [1, 1]} : vector<8x96xf32> to vector<8x32xf32>
    %126 = vector.broadcast %13 : vector<1x32xf32> to vector<8x32xf32>
    %127 = arith.addf %125, %126 : vector<8x32xf32>
    %128 = arith.mulf %113, %127 : vector<8x32xf32>
    %129 = arith.addf %124, %128 : vector<8x32xf32>
    %130 = math.tanh %129 : vector<8x32xf32>
    %131 = arith.subf %98, %130 : vector<8x32xf32>
    %132 = arith.mulf %123, %131 : vector<8x32xf32>
    %133 = arith.addf %130, %132 : vector<8x32xf32>
    %134 = arith.addi %15, %c2_i32 : i32
    %135 = vector.broadcast %134 : i32 to vector<8x1xi32>
    %136 = arith.cmpi slt, %135, %14 : vector<8x1xi32>
    %137 = vector.shape_cast %136 : vector<8x1xi1> to vector<8x1xi1>
    %138 = vector.broadcast %137 : vector<8x1xi1> to vector<8x32xi1>
    %139 = arith.select %138, %133, %98 : vector<8x32xi1>, vector<8x32xf32>
    %c3_i32 = arith.constant 3 : i32
    %140 = arith.index_cast %c3_i32 : i32 to index
    %c0_46 = arith.constant 0 : index
    %c0_47 = arith.constant 0 : index
    %141 = vector.load %arg9[%140, %c0_46, %c0_47] : memref<4x8x96xf32, #tpu.memory_space<vmem>>, vector<1x8x96xf32>
    %142 = vector.shape_cast %141 : vector<1x8x96xf32> to vector<8x96xf32>
    %143 = arith.truncf %139 : vector<8x32xf32> to vector<8x32xbf16>
    %cst_48 = arith.constant dense<0.000000e+00> : vector<8x96xf32>
    %144 = tpu.matmul %143, %12, %cst_48 {dimension_numbers = #tpu.dot_dimension_numbers<[1], [0], [0], [1], [0, 0, 1, 1], [], []>} : vector<8x32xbf16>, vector<32x96xbf16>, vector<8x96xf32> -> vector<8x96xf32>
    %145 = vector.extract_strided_slice %142 {offsets = [0, 0], sizes = [8, 32], strides = [1, 1]} : vector<8x96xf32> to vector<8x32xf32>
    %146 = vector.extract_strided_slice %144 {offsets = [0, 0], sizes = [8, 32], strides = [1, 1]} : vector<8x96xf32> to vector<8x32xf32>
    %147 = arith.addf %145, %146 : vector<8x32xf32>
    %cst_49 = arith.constant 5.000000e-01 : f32
    %148 = vector.broadcast %cst_49 : f32 to vector<8x32xf32>
    %149 = arith.mulf %148, %147 : vector<8x32xf32>
    %150 = math.tanh %149 : vector<8x32xf32>
    %cst_50 = arith.constant 1.000000e+00 : f32
    %151 = vector.broadcast %cst_50 : f32 to vector<8x32xf32>
    %152 = arith.addf %150, %151 : vector<8x32xf32>
    %cst_51 = arith.constant 5.000000e-01 : f32
    %153 = vector.broadcast %cst_51 : f32 to vector<8x32xf32>
    %154 = arith.mulf %153, %152 : vector<8x32xf32>
    %155 = vector.extract_strided_slice %142 {offsets = [0, 32], sizes = [8, 32], strides = [1, 1]} : vector<8x96xf32> to vector<8x32xf32>
    %156 = vector.extract_strided_slice %144 {offsets = [0, 32], sizes = [8, 32], strides = [1, 1]} : vector<8x96xf32> to vector<8x32xf32>
    %157 = arith.addf %155, %156 : vector<8x32xf32>
    %cst_52 = arith.constant 5.000000e-01 : f32
    %158 = vector.broadcast %cst_52 : f32 to vector<8x32xf32>
    %159 = arith.mulf %158, %157 : vector<8x32xf32>
    %160 = math.tanh %159 : vector<8x32xf32>
    %cst_53 = arith.constant 1.000000e+00 : f32
    %161 = vector.broadcast %cst_53 : f32 to vector<8x32xf32>
    %162 = arith.addf %160, %161 : vector<8x32xf32>
    %cst_54 = arith.constant 5.000000e-01 : f32
    %163 = vector.broadcast %cst_54 : f32 to vector<8x32xf32>
    %164 = arith.mulf %163, %162 : vector<8x32xf32>
    %165 = vector.extract_strided_slice %142 {offsets = [0, 64], sizes = [8, 32], strides = [1, 1]} : vector<8x96xf32> to vector<8x32xf32>
    %166 = vector.extract_strided_slice %144 {offsets = [0, 64], sizes = [8, 32], strides = [1, 1]} : vector<8x96xf32> to vector<8x32xf32>
    %167 = vector.broadcast %13 : vector<1x32xf32> to vector<8x32xf32>
    %168 = arith.addf %166, %167 : vector<8x32xf32>
    %169 = arith.mulf %154, %168 : vector<8x32xf32>
    %170 = arith.addf %165, %169 : vector<8x32xf32>
    %171 = math.tanh %170 : vector<8x32xf32>
    %172 = arith.subf %139, %171 : vector<8x32xf32>
    %173 = arith.mulf %164, %172 : vector<8x32xf32>
    %174 = arith.addf %171, %173 : vector<8x32xf32>
    %175 = arith.addi %15, %c3_i32 : i32
    %176 = vector.broadcast %175 : i32 to vector<8x1xi32>
    %177 = arith.cmpi slt, %176, %14 : vector<8x1xi32>
    %178 = vector.shape_cast %177 : vector<8x1xi1> to vector<8x1xi1>
    %179 = vector.broadcast %178 : vector<8x1xi1> to vector<8x32xi1>
    %180 = arith.select %179, %174, %139 : vector<8x32xi1>, vector<8x32xf32>
    %c4_i32_55 = arith.constant 4 : i32
    %c0_56 = arith.constant 0 : index
    %c0_57 = arith.constant 0 : index
    %181 = vector.load %arg10[%c0_56, %c0_57] : memref<8x32xf32, #tpu.memory_space<vmem>>, vector<8x32xf32>
    tpu.vector_store %arg10[%c0_56, %c0_57], %180 {strides = array<i32>} : memref<8x32xf32, #tpu.memory_space<vmem>>, vector<8x32xf32>,
    %c1_i32_58 = arith.constant 1 : i32
    %182 = arith.cmpi eq, %arg1, %c1_i32_58 : i32
    %183 = arith.extui %182 : i1 to i32
    %c0_i32_59 = arith.constant 0 : i32
    %184 = arith.cmpi ne, %183, %c0_i32_59 : i32
    scf.if %184 {
      %c0_60 = arith.constant 0 : index
      %c0_61 = arith.constant 0 : index
      %185 = vector.load %arg8[%c0_60, %c0_61] : memref<8x32xf32, #tpu.memory_space<vmem>>, vector<8x32xf32>
      tpu.vector_store %arg8[%c0_60, %c0_61], %180 {strides = array<i32>} : memref<8x32xf32, #tpu.memory_space<vmem>>, vector<8x32xf32>,
    } else {
    }
    return
  }
  func.func @transform_0(%arg0: i32, %arg1: i32) -> (i32, i32, i32) {
    %c0_i32 = arith.constant 0 : i32
    %c0_i32_0 = arith.constant 0 : i32
    return %arg1, %arg0, %c0_i32 : i32, i32, i32
  }
  func.func @transform_1(%arg0: i32, %arg1: i32) -> (i32, i32) {
    %c0_i32 = arith.constant 0 : i32
    %c0_i32_0 = arith.constant 0 : i32
    return %arg0, %c0_i32 : i32, i32
  }
  func.func @transform_2(%arg0: i32, %arg1: i32) -> (i32, i32) {
    %c0_i32 = arith.constant 0 : i32
    %c0_i32_0 = arith.constant 0 : i32
    %c0_i32_1 = arith.constant 0 : i32
    return %c0_i32, %c0_i32_0 : i32, i32
  }
  func.func @transform_3(%arg0: i32, %arg1: i32) -> (i32, i32) {
    %c0_i32 = arith.constant 0 : i32
    %c0_i32_0 = arith.constant 0 : i32
    %c0_i32_1 = arith.constant 0 : i32
    return %c0_i32, %c0_i32_0 : i32, i32
  }
  func.func @transform_4(%arg0: i32, %arg1: i32) -> (i32, i32) {
    %c0_i32 = arith.constant 0 : i32
    %c0_i32_0 = arith.constant 0 : i32
    %c0_i32_1 = arith.constant 0 : i32
    return %c0_i32, %c0_i32_0 : i32, i32
  }
  func.func @transform_5(%arg0: i32, %arg1: i32) -> (i32, i32) {
    %c0_i32 = arith.constant 0 : i32
    %c0_i32_0 = arith.constant 0 : i32
    %c0_i32_1 = arith.constant 0 : i32
    return %c0_i32, %c0_i32_0 : i32, i32
  }
  func.func @transform_6(%arg0: i32, %arg1: i32) -> (i32, i32) {
    %c0_i32 = arith.constant 0 : i32
    %c0_i32_0 = arith.constant 0 : i32
    return %arg0, %c0_i32 : i32, i32
  }
}

</mosaic_0001>

<bundles_post_ra>
// kernel: tpu_custom_call.1
= control target key start
LH: loop header
LB: loop body
LE: loop exit
PB: predicated region body
PF: predicated region fallthrough
CT: control target
= control target key end

     0   :  { %11 = vsyncpa [#allocation5], 0  ;;  %s1566_s0 = inlined_call_operand.hbm [shape: bf16[8,8,16], index: 0, kind: input, shape index: {}]   ;;  %s1567_s1 = inlined_call_operand.vmem [shape: s32[8,1], index: 1, kind: input, shape index: {}]   ;;  %s1568_s2 = inlined_call_operand.hbm [shape: bf16[16,96], index: 2, kind: input, shape index: {}]   ;;  %s1569_s3 = inlined_call_operand.vmem [shape: bf16[32,96], index: 3, kind: input, shape index: {}]   ;;  %s1570_s4 = inlined_call_operand.vmem [shape: f32[1,96], index: 4, kind: input, shape index: {}]   ;;  %s1571_s5 = inlined_call_operand.vmem [shape: f32[1,32], index: 5, kind: input, shape index: {}]   ;;  %s1572_s6 = inlined_call_operand.hbm [shape: f32[8,32], index: 6, kind: output, shape index: {}]  }
   0x1   :  { %13 = vsyncpa [#allocation5 + $0x1], 0 }
   0x2   :  { %14 = vsyncpa [#allocation8], 0 }
   0x3   :  { %15 = vsyncpa [#allocation6], 0  ;;  %s1272_s21 = smov 0   ;;  %s1274_s22 = smov 0  }
   0x4   :  { %s1276_s23 = smov 0   ;;  %s1278_s24 = smov 0  }
   0x5   :  { %s1280_s25 = smov 0   ;;  %s1282_s26 = smov 0  }
   0x6 LB: > { %s891_s27 = sadd.s32 4294967295, %s1223_s26   ;;  %p55_p0 = scmp.ne.s32.totalorder %s1207_s22, %s1203_s21  ;;  %s1223_s26 = sphi %s1282_s26, %s21_s26   ;;  %s1219_s25 = sphi %s1280_s25, %s1590_s25   ;;  %s1215_s24 = sphi %s1278_s24, %s1589_s24   ;;  %s1211_s23 = sphi %s1276_s23, %s1588_s23   ;;  %s1207_s22 = sphi %s1274_s22, %s1587_s22   ;;  %s1203_s21 = sphi %s1272_s21, %s1586_s21  }
   0x7   : > { %p1304_p1 = scmp.eq.s32.totalorder %s891_s27, 0  ;;  %p892_p2 = scmp.ge.s32.totalorder %s1223_s26, 1 }
   0x8   : > { %p202_p3 = scmp.lt.s32.totalorder %s1223_s26, 3  ;;  %s1225_s7 = smov [#allocation7]  }
   0x9   : > { %s1577_s28 = scalar_select %p1304_p1, 1, 0 }
   0xa   : > { %p1312_p4 = por %p1304_p1, %p55_p0  ;;  %p1316_p5 = pnand %p892_p2, %p202_p3 }
   0xb   : > { %s221_s8 = sshll.u32 %s1225_s7, 4  ;;  %s30_s10 = sadd.s32 1, %s1219_s25  ;;  %s222_s8 = int_to_ptr.vmem [resolvable:$true] %s221_s8 }
   0xc   : > { %s1578_s29 = scalar_select %p1312_p4, 1, 0 }
   0xd   : > { %s1579_s30 = scalar_select %p1316_p5, 1, 0 }
   0xe   : > { %p986_p6 = pneg %p1316_p5  ;;  %s1081_s13 = scalar_lea.hbm %s1568_s2, 128 }
   0xf   : > { %p1082_p8 = scmp.ne.s32.totalorder %s1568_s2, %s1081_s13  ;;  %p1088_p12 = scmp.lt.u32.totalorder %s1081_s13, %s1568_s2 }
  0x10   : > { %p1324_p7 = pnand %p986_p6, %p1304_p1 }
  0x12   : > { %p1083_p9 = pneg %p1324_p7 }
  0x14   : > { %p1084_p10 = pnand %p1083_p9, %p1082_p8 }
  0x16   : > { %p1085_p11 = pneg %p1084_p10 }
  0x18   : > { %p1090_p13 = pnand %p1088_p12, %p1085_p11 }
  0x1a   : > { %1093 = shalt.err (!%p1090_p13)
}
  0x1b   : > { %s1094_s18 = scalar_lea.vmem %s222_s8, 128  ;;  %p1102_p6 = scmp.lt.s32.totalorder %s222_s8, %s222_s8 }
  0x1c   : > { %p1095_p0 = scmp.ne.s32.totalorder %s222_s8, %s1094_s18  ;;  %p1103_p1 = scmp.lt.s32.totalorder %s1094_s18, %s1094_s18 }
  0x1e   : > { %p1097_p2 = pnand %p1095_p0, %p1083_p9  ;;  %p1104_p4 = por %p1103_p1, %p1102_p6 }
  0x20   : > { %p1098_p3 = pneg %p1097_p2 }
  0x22   : > { %p1105_p5 = pnand %p1104_p4, %p1098_p3 }
  0x24   : > { %1108 = shalt.err (!%p1105_p5)
}
  0x25   : > { %s1226_s19 = smov 64   ;;  %s1227_s20 = smov 4  }
  0x26   : > { %989 = dma.hbm_to_vmem [thread:$0]  (!%p1324_p7), %s1568_s2, 128, %s222_s8, [#allocation8], %s1226_s19, %s1226_s19, %s1227_s20  }
  0x27   : > { %p31_p1 = scmp.ge.s32.totalorder %s30_s10, 2  ;;  %s42_s11 = sadd.s32 1, %s1211_s23 }
  0x28   : > { %p49_p4 = scmp.ne.s32.totalorder %s1211_s23, %s1207_s22  ;;  %p50_p5 = scmp.eq.s32.totalorder %s1223_s26, 0 }
  0x29   : > { %s1592_s10 = smov (%p31_p1, %s30_s10), 0  ;;  %p995_p9 = scmp.lt.s32.totalorder %s1223_s26, 2 }
  0x2a   : > { %p51_p8 = por %p50_p5, %p49_p4  ;;  %s37_s12 = ssub.s32 %s1219_s25, %s1592_s10 }
  0x2b   : > { %s244_s13 = sand.u32 1, %s1211_s23   ;;  %p40_p10 = scmp.eq.s32.totalorder %s37_s12, 0 }
  0x2c   : > { %s896_s9 = sshll.u32 %s244_s13, 4  ;;  %s922_s14 = sshll.u32 %s1219_s25, 8 }
  0x2d   : > { %s1360_s15 = scalar_select %p40_p10, %s1211_s23, %s42_s11  }
  0x2e   : > { %s1365_s8 = scalar_lea.hbm %s1566_s0, %s922_s14  ;;  %s248_s18 = scalar_lea.vmem [#allocation4], %s896_s9 }
  0x2f   : > { %s256_s21 = sshll.u32 %s248_s18, 4  ;;  %p1367_p7 = pnand %p995_p9, %p51_p8  ;;  %s1371_s21 = int_to_ptr.vmem [resolvable:$true] %s256_s21 }
  0x30   : > { %s1373_s11 = scalar_lea.sflag [#allocation5], %s244_s13  ;;  %s1109_s12 = scalar_lea.hbm %s1365_s8, 256 }
  0x31   : > { %p1110_p11 = scmp.ne.s32.totalorder %s1365_s8, %s1109_s12  ;;  %p1111_p12 = pneg %p1367_p7 }
  0x32   : > { %s1114_s16 = scalar_lea.hbm %s1566_s0, 512  ;;  %p1115_p2 = scmp.lt.u32.totalorder %s1365_s8, %s1566_s0 }
  0x33   : > { %p1112_p13 = pnand %p1111_p12, %p1110_p11  ;;  %p1116_p3 = scmp.lt.u32.totalorder %s1114_s16, %s1109_s12 }
  0x34   : > { %p1118_p1 = scmp.lt.u32.totalorder %s1109_s12, %s1365_s8 }
  0x35   : > { %p1113_p0 = pneg %p1112_p13  ;;  %p1117_p6 = por %p1116_p3, %p1115_p2 }
  0x37   : > { %p1119_p4 = por %p1118_p1, %p1117_p6 }
  0x39   : > { %p1120_p5 = pnand %p1119_p4, %p1113_p0 }
  0x3b   : > { %1123 = shalt.err (!%p1120_p5)
}
  0x3c   : > { %s1124_s13 = scalar_lea.vmem %s1371_s21, 256  ;;  %s1228_s9 = smov [#allocation4]  }
  0x3d   : > { %p1125_p8 = scmp.ne.s32.totalorder %s1371_s21, %s1124_s13  ;;  %s1129_s14 = sshll.u32 %s1228_s9, 4  ;;  %s1130_s14 = int_to_ptr.vmem [resolvable:$false] %s1129_s14 }
  0x3e   : > { %s1131_s17 = scalar_lea.vmem %s1130_s14, 512  ;;  %p1132_p11 = scmp.lt.s32.totalorder %s1371_s21, %s1130_s14 }
  0x3f   : > { %p1127_p9 = pnand %p1125_p8, %p1111_p12  ;;  %p1133_p13 = scmp.lt.s32.totalorder %s1131_s17, %s1124_s13 }
  0x41   : > { %p1128_p10 = pneg %p1127_p9  ;;  %p1134_p2 = por %p1133_p13, %p1132_p11 }
  0x43   : > { %p1135_p3 = pnand %p1134_p2, %p1128_p10 }
  0x45   : > { %1138 = shalt.err (!%p1135_p3)
}
  0x46   : > { %993 = dma.hbm_to_vmem [thread:$0]  (!%p1367_p7), %s1365_s8, 256, %s1371_s21, %s1373_s11, %s1226_s19, %s1226_s19, %s1227_s20  }
  0x47   : > { %p1582_p12 = scmp.ne.s32.totalorder %s1579_s30, 0 }
  0x48   : > { %s270_s12 = sand.u32 (!%p1582_p12), 1, %s1207_s22   ;;  %p1583_p0 = scmp.ne.s32.totalorder (!%p1582_p12), %s1578_s29, 0 }
  0x49   : > { %268 = sbr.rel (%p1582_p12) target bundleno = 3493 (0xda5), region = 44  ;;  %s900_s16 = sshll.u32 (!%p1582_p12), %s270_s12, 4 }
  0x4a   : > { %s271_s18 = scalar_lea.sflag (!%p1582_p12), [#allocation5], %s270_s12  ;;  %s274_s13 = scalar_lea.vmem (!%p1582_p12), [#allocation4], %s900_s16 }
  0x50   : > { %1190 = dma.done.wait (%p1583_p0), %s271_s18, 256  }
  0x51   : > { %1192 = vsyncadd (%p1583_p0), %s271_s18, 4294967040  ;;  %p1584_p6 = scmp.ne.s32.totalorder %s1577_s28, 0 }
  0x53   : > { %1194 = dma.done.wait (%p1584_p6), [#allocation8], 128  }
  0x54   : > { %1196 = vsyncadd (%p1584_p6), [#allocation8], 4294967168  ;;  %p902_p7 = scmp.ne.s32.totalorder %s1215_s24, 0 }
  0x55   : > { %vm316_vm0 = vcmask (!%p902_p7), 261120   ;;  %v1229_v0 = vmov (!%p902_p7), 0.0  }
  0x56   : > { %315 = sbr.rel (%p902_p7) target bundleno = 93 (0x5d), region = 56  ;;  %317 = vst.msk [vmem:[#allocation3] sm:$0xff] (!%p902_p7), %vm316_vm0, %v1229_v0 }
  0x5d PF: > { %v1060_v1 = vld [vmem:[#allocation7] sm:$0xff]   ;;  %v1230_v2 = vmov 0.0   ;;  %v1420_v3 = vld [vmem:[%s1569_s3] sm:$0xff]   ;;  %vm347_vm1 = vcmask 130048   ;;  %vm1231_vm2 = vmmov 0   ;;  %s1232_s21 = smov 64  }
  0x5e   : > { %944 = vmatprep.subr.bf16.mxu1 %v1230_v2  ;;  %938 = vmatprep.subr.bf16.mxu0 %v1060_v1  ;;  %v1062_v4 = vld [vmem:[%s274_s13] sm:$0xff]   ;;  %v1063_v5 = vld [vmem:[%s274_s13 + $0x8] sm:$0xff]   ;;  %vm430_vm3 = vcmask 261120   ;;  %vm403_vm4 = vcmask 785408   ;;  %v1233_v35 = vmov 0   ;;  %s1465_s9 = sshll.u32 %s1215_s24, 2 }
  0x5f   : > { %945 = vmatpush3.bf16.msra.mxu1 %v1420_v3  ;;  %939 = vmatpush3.bf16.msra.mxu0 %v1060_v1  ;;  %v1427_v6 = vld [vmem:[%s1569_s3 + $0x8] sm:$0xff]   ;;  %v1431_v7 = vld [vmem:[#allocation3] sm:$0xff]  ;;  %v514_v37 = vstv %s1465_s9  ;;  %s1234_s12 = smov 32   ;;  %s603_s16 = sadd.s32 1, %s1465_s9 }
  0x60   : > { %940 = vmatprep.mubr.msk.bf16.mxu0 %vm347_vm1, %v1062_v4  ;;  %946 = vmatprep.subr.bf16.mxu1 %v1230_v2  ;;  %v913_v8 = vld [vmem:[%s1571_s5] ss:$0 sm:$0xff]  ;;  %v417_v9 = vpack.c.bf16 %v1431_v7, %v1431_v7  ;;  %v604_v0 = vstv %s603_s16  ;;  %s1235_s18 = smov 96   ;;  %s689_s13 = sadd.s32 2, %s1465_s9 }
  0x61   : > { %948 = vmatprep.mubr.msk.bf16.mxu1 %vm1231_vm2, %v1230_v2  ;;  %952 = vmatprep.subr.bf16.mxu0 %v1230_v2  ;;  %v903_v10 = vld [vmem:[%s1570_s4] ss:$0 sm:$0xff]  ;;  %s775_s30 = sadd.s32 3, %s1465_s9  ;;  %p917_p1 = scmp.ne.s32.totalorder %s1215_s24, 1 }
  0x62   : > { %941 = vmatmul.mubr.msk.bf16.vlgmr.msra.gmra.mrb[0].mxu0 %vm347_vm1, %v1063_v5  ;;  %484 = vrot.lane.b32.xlu0 %v913_v8, %s1232_s21  ;;  %v1470_v36 = vld [vmem:[%s1567_s1] sm:$0xff] }
  0x63   : > { %947 = vmatpush3.bf16.msra.mxu1 %v1427_v6  ;;  %953 = vmatpush3.bf16.msra.mxu0 %v1420_v3  ;;  %vm515_vm5 = vcmp.lt.s32.totalorder %v514_v37, %v1470_v36  ;;  %vm605_vm7 = vcmp.lt.s32.totalorder %v604_v0, %v1470_v36 }
  0x64   : > { %954 = vmatprep.subr.bf16.mxu0 %v1230_v2  ;;  %956 = vmatprep.mubr.msk.bf16.mxu0 %vm1231_vm2, %v1230_v2  ;;  %v516_v39 = vsel %vm515_vm5, 1, %v1233_v35  ;;  %v606_v1 = vsel %vm605_vm7, 1, %v1233_v35 }
  0x65   : > { %960 = vmatprep.subr.bf16.mxu1 %v1230_v2  ;;  %1058 = vset.pattern.permute.xlu1 %v1233_v35 }
  0x66   : > { %949 = vmatmul.mubr.msk.bf16.vlgmr.msra.gmra.mrb[0].mxu1 %vm430_vm3, %v417_v9  ;;  %1059 = vset.pattern.permute.xlu0 %v1233_v35 }
  0x67   : > { %955 = vmatpush3.bf16.msra.mxu0 %v1427_v6  ;;  %961 = vmatpush3.bf16.msra.mxu1 %v1420_v3 }
  0x68   : > { %962 = vmatprep.subr.bf16.mxu1 %v1230_v2  ;;  %964 = vmatprep.mubr.msk.bf16.mxu1 %vm1231_vm2, %v1230_v2 }
  0x69   : > { %968 = vmatprep.subr.bf16.mxu0 %v1230_v2 }
  0x6b   : > { %963 = vmatpush3.bf16.msra.mxu1 %v1427_v6 }
  0xd4   : > { %v1457_v15 = vpop.permute.xlu0 %484 }
 0x135   : > { %v942_v11 = vpop.f32.mrb[0].mxu0 }
 0x136   : > { %v397_v12 = vadd.f32 %v942_v11, %v903_v10  ;;  %v388_v13 = vpop.f32.mrb[1].mxu0 }
 0x137   : > { %v389_v14 = vadd.f32 %v903_v10, %v388_v13  ;;  %v943_v16 = vpop.f32.mrb[2].mxu0 }
 0x138   : > { %406 = vst.msk [vmem:[#allocation2 + $0x10] sm:$0xff] %vm403_vm4, %v397_v12  ;;  %v400_v17 = vadd.f32 %v943_v16, %v903_v10  ;;  %v391_v18 = vpop.f32.mrb[3].mxu0 }
 0x139   : > { %404 = vst.msk [vmem:[#allocation2] sm:$0xff] %vm403_vm4, %v389_v14  ;;  %v468_v19 = vpop.f32.mrb[0].mxu1  ;;  %v392_v20 = vadd.f32 %v903_v10, %v391_v18 }
 0x13a   : > { %v487_v21 = vadd.f32 %v1457_v15, %v468_v19  ;;  %v950_v22 = vpop.f32.mrb[1].mxu1  ;;  %407 = vst.msk [vmem:[#allocation2 + $0x18] sm:$0xff] %vm403_vm4, %v400_v17 }
 0x13b   : > { %v471_v23 = vpop.f32.mrb[2].mxu1  ;;  %405 = vst.msk [vmem:[#allocation2 + $0x8] sm:$0xff] %vm403_vm4, %v392_v20 }
 0x13c   : > { %489 = vrot.lane.b32.xlu0 %v487_v21, %s1232_s21  ;;  %v951_v24 = vpop.f32.mrb[3].mxu1 }
 0x13f   : > { %v613_v20 = vld [vmem:[#allocation2 + $0x10] sm:$0xff] }
 0x140   : > { %v416_v25 = vld [vmem:[#allocation2] sm:$0xff] }
 0x141   : > { %v474_v26 = vadd.f32 %v468_v19, %v416_v25 }
 0x142   : > { %v527_v56 = vld [vmem:[#allocation2 + $0x8] sm:$0xff] }
 0x143   : > { %v475_v27 = vmul.f32 0.5, %v474_v26 }
 0x145   : > { %1065 = vtanh.f32 %v475_v27 }
 0x14f   : > { %v1066_v28 = vpop.eup %1065 }
 0x150   : > { %v477_v29 = vadd.f32 1.0, %v1066_v28 }
 0x152   : > { %v478_v30 = vmul.f32 0.5, %v477_v29 }
 0x1ae   : > { %v490_v31 = vpop.permute.xlu0 %489 }
 0x1af   : > { %v492_v32 = vmul.f32 %v490_v31, %v478_v30 }
 0x1b1   : > { %494 = vrot.lane.b32.xlu1 %v492_v32, %s1232_s21 }
 0x223   : > { %v495_v33 = vpop.permute.xlu1 %494 }
 0x224   : > { %v497_v34 = vadd.f32 %v495_v33, %v416_v25  ;;  %v690_v25 = vstv %s689_s13 }
 0x225   : > { %vm691_vm9 = vcmp.lt.s32.totalorder %v690_v25, %v1470_v36 }
 0x226   : > { %1067 = vtanh.f32 %v497_v34  ;;  %v692_v29 = vsel %vm691_vm9, 1, %v1233_v35 }
 0x230   : > { %v1068_v38 = vpop.eup %1067 }
 0x231   : > { %500 = vrot.lane.b32.xlu1 %v1068_v38, %s1232_s21 }
 0x235   : > { %518 = vperm.xlu1 %1058, %v516_v39  }
 0x239   : > { %522 = vrot.lane.b32.xlu1 %v1431_v7, %s1232_s21 }
 0x2a3   : > { %v501_v40 = vpop.permute.xlu1 %500 }
 0x2a4   : > { %v503_v41 = vsub.f32 %v1431_v7, %v501_v40 }
 0x2a6   : > { %505 = vrot.lane.b32.xlu0 %v503_v41, %s1234_s12 }
 0x2b4   : > { %v519_v44 = vpop.permute.xlu1 %518 }
 0x2b5   : > { %vm520_vm6 = vcmp.eq.s32.totalorder %v519_v44, 1 }
 0x2b8   : > { %v523_v46 = vpop.permute.xlu1 %522 }
 0x318   : > { %v506_v42 = vpop.permute.xlu0 %505 }
 0x319   : > { %v508_v43 = vmul.f32 %v506_v42, %v478_v30 }
 0x31b   : > { %510 = vrot.lane.b32.xlu0 %v508_v43, %s1234_s12 }
 0x38d   : > { %v511_v45 = vpop.permute.xlu0 %510 }
 0x38e   : > { %v513_v47 = vadd.f32 %v1068_v38, %v511_v45 }
 0x390   : > { %v525_v48 = vsel %vm520_vm6, %v513_v47, %v523_v46 }
 0x391   : > { %v528_v49 = vpack.c.bf16 %v525_v48, %v525_v48 }
 0x393   : > { %530 = vrot.lane.b32.xlu0 %v528_v49, %s1232_s21  ;;  %v699_v49 = vld [vmem:[#allocation2 + $0x18] sm:$0xff] }
 0x405   : > { %v531_v50 = vpop.permute.xlu0 %530 }
 0x406   : > { %957 = vmatmul.mubr.msk.bf16.vlgmr.msra.gmra.mrb[4].mxu0 %vm430_vm3, %v531_v50 }
 0x407   : > { %969 = vmatpush3.bf16.msra.mxu0 %v1420_v3  ;;  %972 = vmatprep.mubr.msk.bf16.mxu0 %vm1231_vm2, %v1230_v2 }
 0x408   : > { %970 = vmatprep.subr.bf16.mxu0 %v1230_v2 }
 0x40b   : > { %971 = vmatpush3.bf16.msra.mxu0 %v1427_v6 }
 0x4d9   : > { %v569_v51 = vpop.f32.mrb[4].mxu0 }
 0x4da   : > { %v580_v52 = vadd.f32 %v569_v51, %v1457_v15  ;;  %v958_v53 = vpop.f32.mrb[5].mxu0  ;;  %v575_v57 = vadd.f32 %v569_v51, %v527_v56 }
 0x4db   : > { %v572_v54 = vpop.f32.mrb[6].mxu0 }
 0x4dc   : > { %582 = vrot.lane.b32.xlu1 %v580_v52, %s1232_s21  ;;  %v959_v55 = vpop.f32.mrb[7].mxu0  ;;  %v576_v58 = vmul.f32 0.5, %v575_v57  ;;  %v776_v54 = vstv %s775_s30 }
 0x4dd   : > { %vm777_vm11 = vcmp.lt.s32.totalorder %v776_v54, %v1470_v36 }
 0x4de   : > { %1069 = vtanh.f32 %v576_v58 }
 0x4e8   : > { %v1070_v59 = vpop.eup %1069 }
 0x4e9   : > { %v578_v60 = vadd.f32 1.0, %v1070_v59 }
 0x4eb   : > { %v579_v61 = vmul.f32 0.5, %v578_v60 }
 0x54e   : > { %v583_v62 = vpop.permute.xlu1 %582 }
 0x54f   : > { %v585_v63 = vmul.f32 %v583_v62, %v579_v61 }
 0x551   : > { %587 = vrot.lane.b32.xlu0 %v585_v63, %s1232_s21 }
 0x555   : > { %608 = vperm.xlu0 %1059, %v606_v1  }
 0x5c3   : > { %v588_v2 = vpop.permute.xlu0 %587 }
 0x5c4   : > { %v590_v3 = vadd.f32 %v588_v2, %v527_v56 }
 0x5c6   : > { %1071 = vtanh.f32 %v590_v3 }
 0x5d0   : > { %v1072_v4 = vpop.eup %1071 }
 0x5d1   : > { %v592_v5 = vsub.f32 %v525_v48, %v1072_v4 }
 0x5d3   : > { %594 = vrot.lane.b32.xlu1 %v592_v5, %s1235_s18 }
 0x5d4   : > { %v609_v8 = vpop.permute.xlu0 %608 }
 0x5d5   : > { %vm610_vm8 = vcmp.eq.s32.totalorder %v609_v8, 1 }
 0x645   : > { %v595_v6 = vpop.permute.xlu1 %594 }
 0x646   : > { %v597_v7 = vmul.f32 %v595_v6, %v579_v61 }
 0x648   : > { %599 = vrot.lane.b32.xlu1 %v597_v7, %s1234_s12 }
 0x6ba   : > { %v600_v9 = vpop.permute.xlu1 %599 }
 0x6bb   : > { %v602_v10 = vadd.f32 %v1072_v4, %v600_v9 }
 0x6bd   : > { %v611_v11 = vsel %vm610_vm8, %v602_v10, %v525_v48 }
 0x6be   : > { %v614_v12 = vpack.c.bf16 %v611_v11, %v611_v11 }
 0x6c0   : > { %616 = vrot.lane.b32.xlu1 %v614_v12, %s1232_s21 }
 0x732   : > { %v617_v13 = vpop.permute.xlu1 %616 }
 0x733   : > { %965 = vmatmul.mubr.msk.bf16.vlgmr.msra.gmra.mrb[4].mxu1 %vm430_vm3, %v617_v13 }
 0x806   : > { %v655_v14 = vpop.f32.mrb[4].mxu1 }
 0x807   : > { %v666_v16 = vadd.f32 %v655_v14, %v1457_v15  ;;  %v966_v17 = vpop.f32.mrb[5].mxu1  ;;  %v661_v21 = vadd.f32 %v655_v14, %v613_v20 }
 0x808   : > { %v658_v18 = vpop.f32.mrb[6].mxu1 }
 0x809   : > { %668 = vrot.lane.b32.xlu0 %v666_v16, %s1232_s21  ;;  %v967_v19 = vpop.f32.mrb[7].mxu1  ;;  %v662_v22 = vmul.f32 0.5, %v661_v21 }
 0x80b   : > { %1073 = vtanh.f32 %v662_v22 }
 0x815   : > { %v1074_v23 = vpop.eup %1073 }
 0x816   : > { %v664_v24 = vadd.f32 1.0, %v1074_v23 }
 0x818   : > { %v665_v26 = vmul.f32 0.5, %v664_v24 }
 0x87b   : > { %v669_v27 = vpop.permute.xlu0 %668 }
 0x87c   : > { %v671_v28 = vmul.f32 %v669_v27, %v665_v26 }
 0x87e   : > { %673 = vrot.lane.b32.xlu1 %v671_v28, %s1232_s21 }
 0x882   : > { %694 = vperm.xlu1 %1058, %v692_v29  }
 0x8f0   : > { %v674_v30 = vpop.permute.xlu1 %673 }
 0x8f1   : > { %v676_v31 = vadd.f32 %v674_v30, %v613_v20 }
 0x8f3   : > { %1075 = vtanh.f32 %v676_v31 }
 0x8fd   : > { %v1076_v32 = vpop.eup %1075 }
 0x8fe   : > { %v678_v33 = vsub.f32 %v611_v11, %v1076_v32 }
 0x900   : > { %680 = vrot.lane.b32.xlu0 %v678_v33, %s1235_s18 }
 0x901   : > { %v695_v38 = vpop.permute.xlu1 %694 }
 0x902   : > { %vm696_vm10 = vcmp.eq.s32.totalorder %v695_v38, 1 }
 0x972   : > { %v681_v34 = vpop.permute.xlu0 %680 }
 0x973   : > { %v683_v37 = vmul.f32 %v681_v34, %v665_v26 }
 0x975   : > { %685 = vrot.lane.b32.xlu0 %v683_v37, %s1234_s12 }
 0x9e7   : > { %v686_v39 = vpop.permute.xlu0 %685 }
 0x9e8   : > { %v688_v40 = vadd.f32 %v1076_v32, %v686_v39 }
 0x9ea   : > { %v697_v41 = vsel %vm696_vm10, %v688_v40, %v611_v11 }
 0x9eb   : > { %v700_v42 = vpack.c.bf16 %v697_v41, %v697_v41 }
 0x9ed   : > { %702 = vrot.lane.b32.xlu1 %v700_v42, %s1232_s21 }
 0xa5f   : > { %v703_v43 = vpop.permute.xlu1 %702 }
 0xa60   : > { %973 = vmatmul.mubr.msk.bf16.vlgmr.msra.gmra.mrb[8].mxu0 %vm430_vm3, %v703_v43 }
 0xb33   : > { %v741_v44 = vpop.f32.mrb[8].mxu0 }
 0xb34   : > { %v752_v45 = vadd.f32 %v741_v44, %v1457_v15  ;;  %v974_v46 = vpop.f32.mrb[9].mxu0  ;;  %v747_v50 = vadd.f32 %v741_v44, %v699_v49  ;;  %v778_v15 = vsel %vm777_vm11, 1, %v1233_v35 }
 0xb35   : > { %v744_v47 = vpop.f32.mrb[10].mxu0 }
 0xb36   : > { %754 = vrot.lane.b32.xlu0 %v752_v45, %s1232_s21  ;;  %v975_v48 = vpop.f32.mrb[11].mxu0  ;;  %v748_v51 = vmul.f32 0.5, %v747_v50 }
 0xb38   : > { %1077 = vtanh.f32 %v748_v51 }
 0xb42   : > { %v1078_v52 = vpop.eup %1077 }
 0xb43   : > { %v750_v53 = vadd.f32 1.0, %v1078_v52 }
 0xb45   : > { %v751_v55 = vmul.f32 0.5, %v750_v53 }
 0xba8   : > { %v755_v56 = vpop.permute.xlu0 %754 }
 0xba9   : > { %v757_v57 = vmul.f32 %v755_v56, %v751_v55 }
 0xbab   : > { %759 = vrot.lane.b32.xlu1 %v757_v57, %s1232_s21 }
 0xbaf   : > { %780 = vperm.xlu1 %1058, %v778_v15  }
 0xc1d   : > { %v760_v58 = vpop.permute.xlu1 %759 }
 0xc1e   : > { %v762_v59 = vadd.f32 %v760_v58, %v699_v49 }
 0xc20   : > { %1079 = vtanh.f32 %v762_v59 }
 0xc2a   : > { %v1080_v60 = vpop.eup %1079 }
 0xc2b   : > { %v764_v61 = vsub.f32 %v697_v41, %v1080_v60 }
 0xc2d   : > { %766 = vrot.lane.b32.xlu0 %v764_v61, %s1235_s18 }
 0xc2e   : > { %v781_v0 = vpop.permute.xlu1 %780 }
 0xc2f   : > { %vm782_vm12 = vcmp.eq.s32.totalorder %v781_v0, 1 }
 0xc9f   : > { %v767_v62 = vpop.permute.xlu0 %766 }
 0xca0   : > { %v769_v63 = vmul.f32 %v767_v62, %v751_v55 }
 0xca2   : > { %771 = vrot.lane.b32.xlu0 %v769_v63, %s1234_s12 }
 0xd14   : > { %v772_v1 = vpop.permute.xlu0 %771 }
 0xd15   : > { %v774_v2 = vadd.f32 %v1080_v60, %v772_v1 }
 0xd17   : > { %v783_v36 = vsel %vm782_vm12, %v774_v2, %v697_v41 }
 0xd18   : > { %785 = vrot.lane.b32.xlu1 %v783_v36, %s1232_s21 }
 0xd85   : > { %792 = sbr.rel (%p917_p1) target bundleno = 3468 (0xd8c), region = 60 }
 0xd8a   : > { %v786_v35 = vpop.permute.xlu1 %785 }
 0xd8b   : > { %788 = vst.msk [vmem:[#allocation3] sm:$0xff] %vm430_vm3, %v786_v35  ;;  %793 = vst.msk [vmem:[#allocation9] sm:$0xff] (!%p917_p1), %vm430_vm3, %v786_v35 }
 0xd8c PF: > { %p1522_p4 = scmp.eq.s32.totalorder %s891_s27, 1  ;;  %s1236_s28 = smov [#allocation9]  }
 0xd8d   : > { %s803_s19 = sshll.u32 %s1236_s28, 4  ;;  %s804_s19 = int_to_ptr.vmem [resolvable:$true] %s803_s19 }
 0xd8e   : > { %s1139_s20 = scalar_lea.vmem %s804_s19, 128  ;;  %p1146_p10 = scmp.lt.s32.totalorder %s804_s19, %s804_s19 }
 0xd8f   : > { %p1140_p5 = scmp.ne.s32.totalorder %s804_s19, %s1139_s20  ;;  %p1147_p11 = scmp.lt.s32.totalorder %s1139_s20, %s1139_s20 }
 0xd91   : > { %p1141_p8 = pnand %p1140_p5, %p1522_p4  ;;  %p1148_p13 = por %p1147_p11, %p1146_p10 }
 0xd93   : > { %p1142_p9 = pneg %p1141_p8 }
 0xd95   : > { %p1149_p2 = pnand %p1148_p13, %p1142_p9 }
 0xd97   : > { %1152 = shalt.err (!%p1149_p2)
}
 0xd98   : > { %s1153_s27 = scalar_lea.hbm %s1572_s6, 128 }
 0xd99   : > { %p1154_p3 = scmp.ne.s32.totalorder %s1572_s6, %s1153_s27  ;;  %p1159_p6 = scmp.lt.u32.totalorder %s1153_s27, %s1572_s6 }
 0xd9b   : > { %p1155_p12 = pnand %p1154_p3, %p1522_p4 }
 0xd9d   : > { %p1156_p0 = pneg %p1155_p12 }
 0xd9f   : > { %p1161_p7 = pnand %p1159_p6, %p1156_p0 }
 0xda1   : > { %1164 = shalt.err (!%p1161_p7)
}
 0xda2   : > { %983 = dma.vmem_to_hbm [thread:$0]  (%p1522_p4), %s804_s19, 128, %s1572_s6, [#allocation6]  }
 0xda3   : > { %1198 = dma.done.wait (%p1522_p4), [#allocation6], 128  }
 0xda4   : > { %1200 = vsyncadd (%p1522_p4), [#allocation6], 4294967168 }
 0xda5 PF: > { %s21_s26 = sadd.s32 1, %s1223_s26   ;;  %s1586_s21 = smov %s1207_s22 }
 0xda6   : > { %p18_p1 = scmp.ge.s32.totalorder %s21_s26, 4   ;;  %s1587_s22 = smov %s1211_s23 }
 0xda7   : > { %s1588_s23 = smov %s1360_s15  ;;  %s1589_s24 = smov %s1219_s25 }
 0xda8   : > { %s1590_s25 = smov %s1592_s10  ;;  %20 = sbr.rel (!%p18_p1) target bundleno = 6 (0x6), region = 100 }
 0xdaf   :  { %816 = vsyncpa [#allocation5], 1 }
 0xdb0   :  { %818 = vsyncpa [#allocation5 + $0x1], 1 }
 0xdb1   :  { %819 = vsyncpa [#allocation8], 1 }
 0xdb2   :  { %820 = vsyncpa [#allocation6], 1 }
 0xdb3   :  { %822 = vsyncpa [#allocation6 + $0x1], 1 }

</bundles_post_ra>
